<compile_context>
chip_gen: v7x
topology: tpu7x:2x2x1
jax: 0.10.0
libtpu: 0.0.40
codegen_flags: <defaults>
</compile_context>

<pallas_src>
import functools

import jax
import jax.numpy as jnp
from jax.experimental import pallas as pl
from jax.experimental.pallas import tpu as pltpu

_LANES = 128


def _round_up(x, m):
    return ((x + m - 1) // m) * m


def _deep_prop_classifier_kernel(x_ref, deg_ref, wx_ref, wpack_ref, out_ref,
                                 *, n_experiments):
    MN, F2 = x_ref.shape          # (M*N, 2F)   concatenated [s | t] rows
    M = deg_ref.shape[0]          # flattened batch*experiments
    N = MN // M                   # nodes per sample
    H2 = wx_ref.shape[1]          # 2H
    E = n_experiments
    B = M // E
    M_pad = _round_up(M, 8)
    B_pad = out_ref.shape[0] - M_pad

    # --- fused feature extractor: tanh([s|t] @ blockdiag(ws, wt) + [bs|bt]) ---
    w1 = wx_ref[0:F2, :]                                     # (2F, 2H)
    b1 = wx_ref[F2:F2 + 1, :]                                # (1, 2H)
    h = jnp.tanh(
        jnp.dot(x_ref[...], w1, preferred_element_type=jnp.float32) + b1
    )                                                        # (M*N, 2H)

    # --- pulling: sum-pool over the node axis -> (M, 2H) ---
    pooled = jnp.sum(h.reshape(M, N, H2), axis=1)

    # --- fused pair scorer: lane-broadcast weights so every lane holds comb ---
    w2 = wpack_ref[0:H2, :]                                  # (2H, 128)
    wdeg = wpack_ref[H2:H2 + 2, :]                           # (2, 128)
    bc = wpack_ref[H2 + 2:H2 + 3, :]                         # (1, 128)
    comb_wide = (jnp.dot(pooled, w2, preferred_element_type=jnp.float32)
                 + jnp.dot(deg_ref[...], wdeg,
                           preferred_element_type=jnp.float32)
                 + bc)                                       # (M, 128), lanes equal

    # --- classifier: reshape (-1, E), Linear(E, 2) via lane-padded weights ---
    comb2 = comb_wide[:, 0:1].reshape(B, E)                  # (B, E)
    if B_pad > B:
        comb2 = jnp.concatenate(
            [comb2, jnp.zeros((B_pad - B, E), jnp.float32)], axis=0)
    wcls = wpack_ref[H2 + 8:H2 + 8 + E, :]                   # (E, 128), lanes>=2 zero
    bcls = wpack_ref[H2 + 3:H2 + 4, :]                       # (1, 128), lanes>=2 zero
    logits_pad = (jnp.dot(comb2, wcls, preferred_element_type=jnp.float32)
                  + bcls)                                    # (B_pad, 128)

    # --- single lane-dense output slab: [combined rows | logits rows] ---
    if M_pad > M:
        comb_wide = jnp.concatenate(
            [comb_wide, jnp.zeros((M_pad - M, _LANES), jnp.float32)], axis=0)
    out_ref[...] = jnp.concatenate([comb_wide, logits_pad], axis=0)


def deep_prop_classifier(s, t, pair_degree, params):
    """JAX wrapper reproducing DeepPropClassifier.forward -> (out, pred, combined)."""
    B, E, N, F = s.shape
    M = B * E
    H = params["ws"].shape[1]
    F2, H2 = 2 * F, 2 * H

    # Wrapper-side layout plumbing (free): flatten + concat s|t on feature axis.
    x = jnp.concatenate(
        [s.reshape(M * N, F), t.reshape(M * N, F)], axis=1).astype(jnp.float32)

    # Pack the extractor weights into a block-diagonal matrix + one bias row.
    wx_rows = _round_up(F2 + 1, 8)
    wx = jnp.zeros((wx_rows, H2), jnp.float32)
    wx = wx.at[:F, :H].set(params["ws"])
    wx = wx.at[F:F2, H:].set(params["wt"])
    wx = wx.at[F2, :H].set(params["bs"][0])
    wx = wx.at[F2, H:].set(params["bt"][0])

    # Pack scorer + classifier weights into one lane-wide (128) buffer.
    #   rows [0:2H)       : [wcs; wct] broadcast across all 128 lanes
    #   rows [2H:2H+2)    : wdeg broadcast across lanes
    #   row  [2H+2]       : bc broadcast across lanes
    #   row  [2H+3]       : bcls in lanes 0:2 (rest zero)
    #   rows [2H+8:2H+8+E): wcls in lanes 0:2 (rest zero)
    E_pad = _round_up(E, 8)
    wpack_rows = H2 + 8 + E_pad
    wpack = jnp.zeros((wpack_rows, _LANES), jnp.float32)
    w2 = jnp.concatenate([params["wcs"], params["wct"]], axis=0)   # (2H, 1)
    wpack = wpack.at[:H2, :].set(jnp.broadcast_to(w2, (H2, _LANES)))
    wpack = wpack.at[H2:H2 + 2, :].set(
        jnp.broadcast_to(params["wdeg"], (2, _LANES)))
    wpack = wpack.at[H2 + 2, :].set(params["bc"][0, 0])
    wpack = wpack.at[H2 + 3, :2].set(params["bcls"][0])
    wpack = wpack.at[H2 + 8:H2 + 8 + E, :2].set(params["wcls"])

    M_pad = _round_up(M, 8)
    B_pad = _round_up(B, 8)
    out_rows = M_pad + B_pad

    kernel = functools.partial(_deep_prop_classifier_kernel, n_experiments=E)

    def full_spec(shape):
        nd = len(shape)
        return pl.BlockSpec(shape, lambda i, nd=nd: (0,) * nd)

    inputs = (x, pair_degree.astype(jnp.float32), wx, wpack)
    slab = pl.pallas_call(
        kernel,
        out_shape=jax.ShapeDtypeStruct((out_rows, _LANES), jnp.float32),
        grid=(1,),
        in_specs=[full_spec(a.shape) for a in inputs],
        out_specs=full_spec((out_rows, _LANES)),
        compiler_params=pltpu.CompilerParams(
            dimension_semantics=("arbitrary",)),
    )(*inputs)

    combined = slab[:M, :1]                       # base-model output (M, 1)
    out = slab[M_pad:M_pad + B, :2]               # classifier logits (B, 2)
    # argmax in the wrapper (first-index tie-break, matching torch.argmax)
    pred = jnp.argmax(out, axis=1).astype(jnp.int32)
    return out, pred, combined


def _reference(s, t, pair_degree, params):
    B, E, N, F = s.shape
    M = B * E
    fs = s.reshape(M, N, F)
    ft = t.reshape(M, N, F)
    hs = jnp.tanh(fs @ params["ws"] + params["bs"])
    ht = jnp.tanh(ft @ params["wt"] + params["bt"])
    ps = hs.sum(axis=1)
    pt = ht.sum(axis=1)
    comb = (ps @ params["wcs"] + pt @ params["wct"]
            + pair_degree @ params["wdeg"] + params["bc"])
    logits = comb.reshape(B, E) @ params["wcls"] + params["bcls"]
    pred = jnp.argmax(logits, axis=1).astype(jnp.int32)
    return logits, pred, comb


if __name__ == "__main__":
    B, E, N, F, H = 2, 8, 16, 16, 32   # batch, n_experiments, nodes, features, hidden

    key = jax.random.PRNGKey(0)
    ks = jax.random.split(key, 12)
    s = jax.random.normal(ks[0], (B, E, N, F), jnp.float32)
    t = jax.random.normal(ks[1], (B, E, N, F), jnp.float32)
    pair_degree = jax.random.normal(ks[2], (B * E, 2), jnp.float32)

    params = {
        "ws":   0.1 * jax.random.normal(ks[3], (F, H), jnp.float32),
        "bs":   0.1 * jax.random.normal(ks[4], (1, H), jnp.float32),
        "wt":   0.1 * jax.random.normal(ks[5], (F, H), jnp.float32),
        "bt":   0.1 * jax.random.normal(ks[6], (1, H), jnp.float32),
        "wcs":  0.1 * jax.random.normal(ks[7], (H, 1), jnp.float32),
        "wct":  0.1 * jax.random.normal(ks[8], (H, 1), jnp.float32),
        "bc":   0.1 * jax.random.normal(ks[9], (1, 1), jnp.float32),
        "wdeg": 0.1 * jax.random.normal(ks[10], (2, 1), jnp.float32),
        "wcls": 0.1 * jax.random.normal(ks[11], (E, 2), jnp.float32),
        "bcls": jnp.zeros((1, 2), jnp.float32),
    }

    out, pred, combined = deep_prop_classifier(s, t, pair_degree, params)
    jax.block_until_ready((out, pred, combined))

    ref_out, ref_pred, ref_comb = _reference(s, t, pair_degree, params)
    assert out.shape == (B, 2) and pred.shape == (B,) and combined.shape == (B * E, 1)
    assert jnp.allclose(out, ref_out, atol=1e-4, rtol=1e-4)
    assert jnp.allclose(combined, ref_comb, atol=1e-4, rtol=1e-4)
    assert jnp.array_equal(pred, ref_pred)

    print("KERNEL_OK")
</pallas_src>

<mosaic_0001>
module attributes {stable_mosaic.version = 11 : i64} {
  func.func @_deep_prop_classifier_kernel(%arg0: i32, %arg1: memref<256x32xf32, #tpu.memory_space<vmem>>, %arg2: memref<16x2xf32, #tpu.memory_space<vmem>>, %arg3: memref<40x64xf32, #tpu.memory_space<vmem>>, %arg4: memref<80x128xf32, #tpu.memory_space<vmem>>, %arg5: memref<24x128xf32, #tpu.memory_space<vmem>>) attributes {dimension_semantics = [#tpu.dimension_semantics<arbitrary>], iteration_bounds = array<i64: 1>, scalar_prefetch = 0 : i64, scratch_operands = 0 : i64, tpu.core_type = #tpu.core_type<tc>, window_params = [{pipeline_mode = #tpu.pipeline_mode<synchronous>, transform_indices = @transform_0, window_bounds = array<i64: 256, 32>}, {pipeline_mode = #tpu.pipeline_mode<synchronous>, transform_indices = @transform_1, window_bounds = array<i64: 16, 2>}, {pipeline_mode = #tpu.pipeline_mode<synchronous>, transform_indices = @transform_2, window_bounds = array<i64: 40, 64>}, {pipeline_mode = #tpu.pipeline_mode<synchronous>, transform_indices = @transform_3, window_bounds = array<i64: 80, 128>}, {pipeline_mode = #tpu.pipeline_mode<synchronous>, transform_indices = @transform_4, window_bounds = array<i64: 24, 128>}]} {
    %c0 = arith.constant 0 : index
    %c0_0 = arith.constant 0 : index
    %0 = vector.load %arg3[%c0, %c0_0] : memref<40x64xf32, #tpu.memory_space<vmem>>, vector<32x64xf32>
    %c32 = arith.constant 32 : index
    %c0_1 = arith.constant 0 : index
    %1 = vector.load %arg3[%c32, %c0_1] : memref<40x64xf32, #tpu.memory_space<vmem>>, vector<1x64xf32>
    %c0_2 = arith.constant 0 : index
    %c0_3 = arith.constant 0 : index
    %2 = vector.load %arg1[%c0_2, %c0_3] : memref<256x32xf32, #tpu.memory_space<vmem>>, vector<256x32xf32>
    %cst = arith.constant dense<0.000000e+00> : vector<256x64xf32>
    %3 = tpu.matmul %2, %0, %cst {dimension_numbers = #tpu.dot_dimension_numbers<[1], [0], [0], [1], [0, 0, 1, 1], [], []>} : vector<256x32xf32>, vector<32x64xf32>, vector<256x64xf32> -> vector<256x64xf32>
    %4 = vector.broadcast %1 : vector<1x64xf32> to vector<256x64xf32>
    %5 = arith.addf %3, %4 : vector<256x64xf32>
    %6 = math.tanh %5 : vector<256x64xf32>
    %7 = vector.shape_cast %6 : vector<256x64xf32> to vector<16x16x64xf32>
    %cst_4 = arith.constant dense<0.000000e+00> : vector<16x64xf32>
    %8 = vector.multi_reduction <add>, %7, %cst_4 [1] : vector<16x16x64xf32> to vector<16x64xf32>
    %c0_5 = arith.constant 0 : index
    %c0_6 = arith.constant 0 : index
    %9 = vector.load %arg4[%c0_5, %c0_6] : memref<80x128xf32, #tpu.memory_space<vmem>>, vector<64x128xf32>
    %c64 = arith.constant 64 : index
    %c0_7 = arith.constant 0 : index
    %10 = vector.load %arg4[%c64, %c0_7] : memref<80x128xf32, #tpu.memory_space<vmem>>, vector<2x128xf32>
    %c66 = arith.constant 66 : index
    %c0_8 = arith.constant 0 : index
    %11 = vector.load %arg4[%c66, %c0_8] : memref<80x128xf32, #tpu.memory_space<vmem>>, vector<1x128xf32>
    %cst_9 = arith.constant dense<0.000000e+00> : vector<16x128xf32>
    %12 = tpu.matmul %8, %9, %cst_9 {dimension_numbers = #tpu.dot_dimension_numbers<[1], [0], [0], [1], [0, 0, 1, 1], [], []>} : vector<16x64xf32>, vector<64x128xf32>, vector<16x128xf32> -> vector<16x128xf32>
    %c0_10 = arith.constant 0 : index
    %c0_11 = arith.constant 0 : index
    %13 = vector.load %arg2[%c0_10, %c0_11] : memref<16x2xf32, #tpu.memory_space<vmem>>, vector<16x2xf32>
    %cst_12 = arith.constant dense<0.000000e+00> : vector<16x128xf32>
    %14 = tpu.matmul %13, %10, %cst_12 {dimension_numbers = #tpu.dot_dimension_numbers<[1], [0], [0], [1], [0, 0, 1, 1], [], []>} : vector<16x2xf32>, vector<2x128xf32>, vector<16x128xf32> -> vector<16x128xf32>
    %15 = arith.addf %12, %14 : vector<16x128xf32>
    %16 = vector.broadcast %11 : vector<1x128xf32> to vector<16x128xf32>
    %17 = arith.addf %15, %16 : vector<16x128xf32>
    %18 = vector.extract_strided_slice %17 {offsets = [0, 0], sizes = [16, 1], strides = [1, 1]} : vector<16x128xf32> to vector<16x1xf32>
    %19 = vector.shape_cast %18 : vector<16x1xf32> to vector<2x8xf32>
    %cst_13 = arith.constant 0.000000e+00 : f32
    %20 = vector.broadcast %cst_13 : f32 to vector<6x8xf32>
    %21 = tpu.concatenate %19, %20 in 0 : vector<2x8xf32>, vector<6x8xf32> -> vector<8x8xf32>
    %c72 = arith.constant 72 : index
    %c0_14 = arith.constant 0 : index
    %22 = vector.load %arg4[%c72, %c0_14] : memref<80x128xf32, #tpu.memory_space<vmem>>, vector<8x128xf32>
    %c67 = arith.constant 67 : index
    %c0_15 = arith.constant 0 : index
    %23 = vector.load %arg4[%c67, %c0_15] : memref<80x128xf32, #tpu.memory_space<vmem>>, vector<1x128xf32>
    %cst_16 = arith.constant dense<0.000000e+00> : vector<8x128xf32>
    %24 = tpu.matmul %21, %22, %cst_16 {dimension_numbers = #tpu.dot_dimension_numbers<[1], [0], [0], [1], [0, 0, 1, 1], [], []>} : vector<8x8xf32>, vector<8x128xf32>, vector<8x128xf32> -> vector<8x128xf32>
    %25 = vector.broadcast %23 : vector<1x128xf32> to vector<8x128xf32>
    %26 = arith.addf %24, %25 : vector<8x128xf32>
    %27 = tpu.concatenate %17, %26 in 0 : vector<16x128xf32>, vector<8x128xf32> -> vector<24x128xf32>
    %c0_17 = arith.constant 0 : index
    %c0_18 = arith.constant 0 : index
    %28 = vector.load %arg5[%c0_17, %c0_18] : memref<24x128xf32, #tpu.memory_space<vmem>>, vector<24x128xf32>
    tpu.vector_store %arg5[%c0_17, %c0_18], %27 {strides = array<i32>} : memref<24x128xf32, #tpu.memory_space<vmem>>, vector<24x128xf32>,
    return
  }
  func.func @transform_0(%arg0: i32) -> (i32, i32) {
    %c0_i32 = arith.constant 0 : i32
    %c0_i32_0 = arith.constant 0 : i32
    %c0_i32_1 = arith.constant 0 : i32
    return %c0_i32, %c0_i32_0 : i32, i32
  }
  func.func @transform_1(%arg0: i32) -> (i32, i32) {
    %c0_i32 = arith.constant 0 : i32
    %c0_i32_0 = arith.constant 0 : i32
    %c0_i32_1 = arith.constant 0 : i32
    return %c0_i32, %c0_i32_0 : i32, i32
  }
  func.func @transform_2(%arg0: i32) -> (i32, i32) {
    %c0_i32 = arith.constant 0 : i32
    %c0_i32_0 = arith.constant 0 : i32
    %c0_i32_1 = arith.constant 0 : i32
    return %c0_i32, %c0_i32_0 : i32, i32
  }
  func.func @transform_3(%arg0: i32) -> (i32, i32) {
    %c0_i32 = arith.constant 0 : i32
    %c0_i32_0 = arith.constant 0 : i32
    %c0_i32_1 = arith.constant 0 : i32
    return %c0_i32, %c0_i32_0 : i32, i32
  }
  func.func @transform_4(%arg0: i32) -> (i32, i32) {
    %c0_i32 = arith.constant 0 : i32
    %c0_i32_0 = arith.constant 0 : i32
    %c0_i32_1 = arith.constant 0 : i32
    return %c0_i32, %c0_i32_0 : i32, i32
  }
}

</mosaic_0001>

<bundles_post_ra>
// kernel: tpu_custom_call.1
= control target key start
LH: loop header
LB: loop body
LE: loop exit
PB: predicated region body
PF: predicated region fallthrough
CT: control target
= control target key end

     0   :  { %vm59_vm0 = vcmask 261120   ;;  %s1533_s0 = inlined_call_operand.vmem [shape: f32[256,32], index: 0, kind: input, shape index: {}]   ;;  %s1534_s1 = inlined_call_operand.vmem [shape: f32[16,2], index: 1, kind: input, shape index: {}]   ;;  %s1535_s2 = inlined_call_operand.vmem [shape: f32[40,64], index: 2, kind: input, shape index: {}]   ;;  %s1536_s3 = inlined_call_operand.vmem [shape: f32[80,128], index: 3, kind: input, shape index: {}]   ;;  %s1537_s4 = inlined_call_operand.hbm [shape: f32[24,128], index: 4, kind: output, shape index: {}]  }
   0x1   :  { %v18_v0 = vld [vmem:[%s1535_s2] sm:$0xff]  ;;  %v19_v1 = vld [vmem:[%s1535_s2 + $0x8] sm:$0xff]  ;;  %v20_v2 = vld [vmem:[%s1535_s2 + $0x10] sm:$0xff] }
   0x2   :  { %v1075_v3 = vpack.c.bf16 %v19_v1, %v18_v0  ;;  %v21_v4 = vld [vmem:[%s1535_s2 + $0x18] sm:$0xff]  ;;  %v23_v5 = vld [vmem:[%s1533_s0] sm:$0xff]  ;;  %v45_v7 = vld [vmem:[%s1533_s0 + $0xb0] sm:$0xff] }
   0x3   :  { %v1079_v6 = vpack.c.bf16 %v21_v4, %v20_v2  ;;  %998 = vmatprep.mubr.msk.f32.mxu0 %vm59_vm0, %v23_v5  ;;  %1031 = vmatprep.mubr.msk.f32.mxu1 %vm59_vm0, %v45_v7  ;;  %v24_v8 = vld [vmem:[%s1533_s0 + $0x8] sm:$0xff]  ;;  %v46_v9 = vld [vmem:[%s1533_s0 + $0xb8] sm:$0xff]  ;;  %v25_v10 = vld [vmem:[%s1533_s0 + $0x10] sm:$0xff] }
   0x4   :  { %1076 = vmatprep.subr.bf16.mxu0 %v1075_v3  ;;  %1099 = vmatprep.subr.bf16.mxu1 %v1075_v3  ;;  %v47_v11 = vld [vmem:[%s1533_s0 + $0xc0] sm:$0xff]  ;;  %v26_v12 = vld [vmem:[%s1533_s0 + $0x18] sm:$0xff]  ;;  %v48_v13 = vld [vmem:[%s1533_s0 + $0xc8] sm:$0xff] }
   0x5   :  { %1078 = vmatpush3.bf16.msra.mxu0 %v1075_v3  ;;  %1101 = vmatpush3.bf16.msra.mxu1 %v1075_v3 }
   0x6   :  { %1080 = vmatprep.subr.bf16.mxu0 %v1079_v6  ;;  %1100 = vmatprep.subr.bf16.mxu1 %v1079_v6 }
   0x9   :  { %1082 = vmatpush3.bf16.msra.mxu0 %v1079_v6  ;;  %1102 = vmatpush3.bf16.msra.mxu1 %v1079_v6 }
   0xc   :  { %999 = vmatmul.mubr.msk.f32.vlgmr.msra.gmra.mrb[0].mxu0 %vm59_vm0, %v24_v8  ;;  %1032 = vmatmul.mubr.msk.f32.vlgmr.msra.gmra.mrb[0].mxu1 %vm59_vm0, %v46_v9 }
   0xd   :  { %1001 = vmatprep.mubr.msk.f32.mxu0 %vm59_vm0, %v25_v10  ;;  %1034 = vmatprep.mubr.msk.f32.mxu1 %vm59_vm0, %v47_v11 }
   0xe   :  { %9 = vsyncpa [#allocation3], 0  ;;  %v27_v14 = vld [vmem:[%s1533_s0 + $0x20] sm:$0xff]  ;;  %v49_v15 = vld [vmem:[%s1533_s0 + $0xd0] sm:$0xff]  ;;  %vm577_vm1 = vcmask 1041408   ;;  %vm570_vm2 = vcmask 15360  }
   0xf   :  { %v28_v16 = vld [vmem:[%s1533_s0 + $0x28] sm:$0xff]  ;;  %v50_v17 = vld [vmem:[%s1533_s0 + $0xd8] sm:$0xff]  ;;  %v29_v18 = vld [vmem:[%s1533_s0 + $0x30] sm:$0xff]  ;;  %vm413_vm3 = vcmask 523264   ;;  %vm672_vm4 = vcmask 1041409   ;;  %vm674_vm5 = vcmask 1042434  }
  0x10   :  { %1002 = vmatmul.mubr.msk.f32.gmra.mrb[2].mxu0 %vm59_vm0, %v26_v12  ;;  %1035 = vmatmul.mubr.msk.f32.gmra.mrb[2].mxu1 %vm59_vm0, %v48_v13  ;;  %v51_v19 = vld [vmem:[%s1533_s0 + $0xe0] sm:$0xff]  ;;  %v30_v20 = vld [vmem:[%s1533_s0 + $0x38] sm:$0xff]  ;;  %v52_v21 = vld [vmem:[%s1533_s0 + $0xe8] sm:$0xff]  ;;  %vm676_vm6 = vcmask 1043459   ;;  %vm678_vm7 = vcmask 1044484   ;;  %vm680_vm8 = vcmask 1045509  }
  0x11   :  { %1004 = vmatprep.mubr.msk.f32.mxu0 %vm59_vm0, %v27_v14  ;;  %1037 = vmatprep.mubr.msk.f32.mxu1 %vm59_vm0, %v49_v15  ;;  %v31_v22 = vld [vmem:[%s1533_s0 + $0x40] sm:$0xff]  ;;  %v53_v23 = vld [vmem:[%s1533_s0 + $0xf0] sm:$0xff]  ;;  %v32_v24 = vld [vmem:[%s1533_s0 + $0x48] sm:$0xff]  ;;  %vm682_vm9 = vcmask 1046534   ;;  %vm684_vm10 = vcmask 1047559   ;;  %vm1202_vm11 = vmmov 0  }
  0x12   :  { %v54_v25 = vld [vmem:[%s1533_s0 + $0xf8] sm:$0xff]  ;;  %v33_v26 = vld [vmem:[%s1533_s0 + $0x50] sm:$0xff]  ;;  %v35_v28 = vld [vmem:[%s1533_s0 + $0x60] sm:$0xff]  ;;  %vm805_vm12 = vcmask 64512   ;;  %s1203_s10 = smov [#allocation2]  }
  0x13   :  { %v34_v27 = vld [vmem:[%s1533_s0 + $0x58] sm:$0xff]  ;;  %v36_v29 = vld [vmem:[%s1533_s0 + $0x68] sm:$0xff]  ;;  %v37_v30 = vld [vmem:[%s1533_s0 + $0x70] sm:$0xff]  ;;  %s887_s11 = sshll.u32 %s1203_s10, 4  ;;  %s888_s11 = int_to_ptr.vmem [resolvable:$true] %s887_s11 }
  0x14   :  { %1005 = vmatmul.mubr.msk.f32.gmra.mrb[4].mxu0 %vm59_vm0, %v28_v16  ;;  %1038 = vmatmul.mubr.msk.f32.gmra.mrb[4].mxu1 %vm59_vm0, %v50_v17  ;;  %v38_v31 = vld [vmem:[%s1533_s0 + $0x78] sm:$0xff]  ;;  %v39_v32 = vld [vmem:[%s1533_s0 + $0x80] sm:$0xff]  ;;  %v40_v33 = vld [vmem:[%s1533_s0 + $0x88] sm:$0xff]  ;;  %s1176_s12 = scalar_lea.vmem %s888_s11, 384  ;;  %p1181_p1 = scmp.lt.s32.totalorder %s888_s11, %s888_s11 }
  0x15   :  { %1007 = vmatprep.mubr.msk.f32.mxu0 %vm59_vm0, %v29_v18  ;;  %1040 = vmatprep.mubr.msk.f32.mxu1 %vm59_vm0, %v51_v19  ;;  %v41_v34 = vld [vmem:[%s1533_s0 + $0x90] sm:$0xff]  ;;  %v42_v35 = vld [vmem:[%s1533_s0 + $0x98] sm:$0xff]  ;;  %v43_v36 = vld [vmem:[%s1533_s0 + $0xa0] sm:$0xff]  ;;  %p1177_p0 = scmp.ne.s32.totalorder %s888_s11, %s1176_s12  ;;  %p1182_p2 = scmp.lt.s32.totalorder %s1176_s12, %s1176_s12 }
  0x16   :  { %v44_v37 = vld [vmem:[%s1533_s0 + $0xa8] sm:$0xff]  ;;  %v566_v38 = vld [vmem:[%s1536_s3 + $0x40] sm:$0x3]  ;;  %v560_v44 = vld [vmem:[%s1536_s3 + $0x10] sm:$0xff] }
  0x17   :  { %1046 = vmatprep.subr.msk.mxu1 %vm577_vm1, %v566_v38  ;;  %v568_v39 = vld [vmem:[%s1534_s1] sm:$0xff]  ;;  %v569_v40 = vld [vmem:[%s1534_s1 + $0x8] sm:$0xff]  ;;  %v561_v45 = vld [vmem:[%s1536_s3 + $0x18] sm:$0xff]  ;;  %p1183_p3 = por %p1182_p2, %p1181_p1 }
  0x18   :  { %1008 = vmatmul.mubr.msk.f32.gmra.mrb[6].mxu0 %vm59_vm0, %v30_v20  ;;  %1041 = vmatmul.mubr.msk.f32.gmra.mrb[6].mxu1 %vm59_vm0, %v52_v21  ;;  %v558_v41 = vld [vmem:[%s1536_s3] sm:$0xff]  ;;  %v559_v42 = vld [vmem:[%s1536_s3 + $0x8] sm:$0xff]  ;;  %v1087_v47 = vpack.c.bf16 %v561_v45, %v560_v44  ;;  %v564_v50 = vld [vmem:[%s1536_s3 + $0x30] sm:$0xff] }
  0x19   :  { %1010 = vmatprep.mubr.msk.f32.mxu0 %vm59_vm0, %v31_v22  ;;  %1043 = vmatprep.mubr.msk.f32.mxu1 %vm59_vm0, %v53_v23  ;;  %v1083_v43 = vpack.c.bf16 %v559_v42, %v558_v41  ;;  %v562_v46 = vld [vmem:[%s1536_s3 + $0x20] sm:$0xff]  ;;  %v563_v48 = vld [vmem:[%s1536_s3 + $0x28] sm:$0xff]  ;;  %v565_v51 = vld [vmem:[%s1536_s3 + $0x38] sm:$0xff]  ;;  %p1184_p4 = pnand %p1183_p3, %p1177_p0 }
  0x1a   :  { %1047 = vmatpush3.msk.msra.mxu1 %vm577_vm1, %v566_v38  ;;  %v1091_v49 = vpack.c.bf16 %v563_v48, %v562_v46  ;;  %v1095_v52 = vpack.c.bf16 %v565_v51, %v564_v50  ;;  %v1409_v53 = vld [vmem:[%s1535_s2 + $0x20] ss:$0 sm:$0xff] }
  0x1b   :  { %1084 = vmatprep.subr.bf16.mxu1 %v1083_v43 }
  0x1c   :  { %1011 = vmatmul.mubr.msk.f32.gmra.mrb[8].mxu0 %vm59_vm0, %v32_v24  ;;  %1044 = vmatmul.mubr.msk.f32.gmra.mrb[8].mxu1 %vm59_vm0, %v54_v25 }
  0x1d   :  { %1013 = vmatprep.mubr.msk.f32.mxu0 %vm59_vm0, %v33_v26  ;;  %1048 = vmatprep.mubr.msk.f32.mxu1 %vm570_vm2, %v568_v39 }
  0x20   :  { %1014 = vmatmul.mubr.msk.f32.gmra.mrb[10].mxu0 %vm59_vm0, %v34_v27  ;;  %1049 = vmatmul.mubr.msk.f32.vlgmr.msra.gmra.mrb[10].mxu1 %vm570_vm2, %v569_v40 }
  0x21   :  { %1016 = vmatprep.mubr.msk.f32.mxu0 %vm59_vm0, %v35_v28  ;;  %1086 = vmatpush3.bf16.msra.mxu1 %v1083_v43 }
  0x22   :  { %1088 = vmatprep.subr.bf16.mxu1 %v1087_v47 }
  0x24   :  { %1017 = vmatmul.mubr.msk.f32.gmra.mrb[12].mxu0 %vm59_vm0, %v36_v29 }
  0x25   :  { %1019 = vmatprep.mubr.msk.f32.mxu0 %vm59_vm0, %v37_v30  ;;  %1090 = vmatpush3.bf16.msra.mxu1 %v1087_v47 }
  0x26   :  { %1092 = vmatprep.subr.bf16.mxu1 %v1091_v49 }
  0x28   :  { %1020 = vmatmul.mubr.msk.f32.gmra.mrb[14].mxu0 %vm59_vm0, %v38_v31 }
  0x29   :  { %1022 = vmatprep.mubr.msk.f32.mxu0 %vm59_vm0, %v39_v32  ;;  %1094 = vmatpush3.bf16.msra.mxu1 %v1091_v49 }
  0x2a   :  { %1096 = vmatprep.subr.bf16.mxu1 %v1095_v52 }
  0x2c   :  { %1023 = vmatmul.mubr.msk.f32.gmra.mrb[16].mxu0 %vm59_vm0, %v40_v33 }
  0x2d   :  { %1025 = vmatprep.mubr.msk.f32.mxu0 %vm59_vm0, %v41_v34  ;;  %1098 = vmatpush3.bf16.msra.mxu1 %v1095_v52 }
  0x30   :  { %1026 = vmatmul.mubr.msk.f32.gmra.mrb[18].mxu0 %vm59_vm0, %v42_v35 }
  0x31   :  { %1028 = vmatprep.mubr.msk.f32.mxu0 %vm59_vm0, %v43_v36 }
  0x34   :  { %1029 = vmatmul.mubr.msk.f32.gmra.mrb[20].mxu0 %vm59_vm0, %v44_v37 }
  0xdf   :  { %v1000_v54 = vpop.f32.mrb[0].mxu0  ;;  %v1033_v55 = vpop.f32.mrb[0].mxu1 }
  0xe0   :  { %v228_v56 = vadd.f32 %v1000_v54, %v1409_v53  ;;  %v222_v57 = vpop.f32.mrb[1].mxu0  ;;  %v338_v58 = vadd.f32 %v1033_v55, %v1409_v53  ;;  %v332_v59 = vpop.f32.mrb[1].mxu1 }
  0xe1   :  { %v223_v60 = vadd.f32 %v1409_v53, %v222_v57  ;;  %v333_v61 = vadd.f32 %v1409_v53, %v332_v59 }
  0xe2   :  { %1112 = vtanh.f32 %v228_v56 }
  0xe3   :  { %1114 = vtanh.f32 %v223_v60  ;;  %v1003_v62 = vpop.f32.mrb[2].mxu0  ;;  %v1036_v63 = vpop.f32.mrb[2].mxu1 }
  0xe4   :  { %v238_v0 = vadd.f32 %v1003_v62, %v1409_v53  ;;  %v232_v1 = vpop.f32.mrb[3].mxu0  ;;  %1116 = vtanh.f32 %v338_v58  ;;  %v348_v2 = vadd.f32 %v1036_v63, %v1409_v53  ;;  %v342_v3 = vpop.f32.mrb[3].mxu1 }
  0xe5   :  { %v233_v4 = vadd.f32 %v1409_v53, %v232_v1  ;;  %1118 = vtanh.f32 %v333_v61  ;;  %v343_v5 = vadd.f32 %v1409_v53, %v342_v3 }
  0xe6   :  { %1120 = vtanh.f32 %v238_v0 }
  0xe7   :  { %1122 = vtanh.f32 %v233_v4  ;;  %v1006_v6 = vpop.f32.mrb[4].mxu0  ;;  %v1039_v7 = vpop.f32.mrb[4].mxu1 }
  0xe8   :  { %v248_v8 = vadd.f32 %v1006_v6, %v1409_v53  ;;  %v242_v9 = vpop.f32.mrb[5].mxu0  ;;  %1124 = vtanh.f32 %v348_v2  ;;  %v352_v10 = vpop.f32.mrb[5].mxu1  ;;  %v358_v12 = vadd.f32 %v1039_v7, %v1409_v53 }
  0xe9   :  { %v243_v11 = vadd.f32 %v1409_v53, %v242_v9  ;;  %1126 = vtanh.f32 %v343_v5  ;;  %v353_v18 = vadd.f32 %v1409_v53, %v352_v10 }
  0xea   :  { %1128 = vtanh.f32 %v248_v8 }
  0xeb   :  { %1130 = vtanh.f32 %v243_v11  ;;  %v1009_v13 = vpop.f32.mrb[6].mxu0  ;;  %v1042_v14 = vpop.f32.mrb[6].mxu1 }
  0xec   :  { %v1113_v15 = vpop.eup %1112  ;;  %v258_v16 = vadd.f32 %v1009_v13, %v1409_v53  ;;  %v252_v17 = vpop.f32.mrb[7].mxu0  ;;  %1132 = vtanh.f32 %v358_v12  ;;  %v368_v34 = vadd.f32 %v1042_v14, %v1409_v53 }
  0xed   :  { %v362_v19 = vpop.f32.mrb[7].mxu1  ;;  %v1115_v20 = vpop.eup %1114  ;;  %v415_v21 = vsel %vm413_vm3, %v1113_v15, 0.0  ;;  %v253_v22 = vadd.f32 %v1409_v53, %v252_v17 }
  0xee   :  { %v1117_v23 = vpop.eup %1116  ;;  %v414_v24 = vsel %vm413_vm3, %v1115_v20, 0.0  ;;  %1134 = vtanh.f32 %v258_v16  ;;  %v363_v40 = vadd.f32 %v1409_v53, %v362_v19 }
  0xef   :  { %v1119_v25 = vpop.eup %1118  ;;  %v416_v26 = vadd.f32 %v415_v21, %v414_v24  ;;  %1136 = vtanh.f32 %v253_v22  ;;  %v1012_v27 = vpop.f32.mrb[8].mxu0  ;;  %v514_v28 = vsel %vm413_vm3, %v1117_v23, 0.0 }
  0xf0   :  { %v1428_v29 = vpop.f32.mrb[8].mxu1  ;;  %v1121_v30 = vpop.eup %1120  ;;  %v268_v31 = vadd.f32 %v1012_v27, %v1409_v53  ;;  %v513_v33 = vsel %vm413_vm3, %v1119_v25, 0.0  ;;  %1138 = vtanh.f32 %v353_v18 }
  0xf1   :  { %v262_v32 = vpop.f32.mrb[9].mxu0  ;;  %v372_v35 = vpop.f32.mrb[9].mxu1  ;;  %v424_v37 = vsel %vm413_vm3, %v1121_v30, 0.0  ;;  %v1435_v39 = vadd.f32 %v514_v28, %v513_v33  ;;  %v417_v44 = vrot.slane %v416_v26, 4  ;;  %v378_v24 = vadd.f32 %v1428_v29, %v1409_v53 }
  0xf2   :  { %v1123_v36 = vpop.eup %1122  ;;  %v263_v38 = vadd.f32 %v1409_v53, %v262_v32  ;;  %1140 = vtanh.f32 %v268_v31  ;;  %v373_v25 = vadd.f32 %v1409_v53, %v372_v35 }
  0xf3   :  { %v1125_v41 = vpop.eup %1124  ;;  %v423_v42 = vsel %vm413_vm3, %v1123_v36, 0.0  ;;  %v1015_v46 = vpop.f32.mrb[10].mxu0  ;;  %v418_v60 = vadd.f32 %v417_v44, %v416_v26 }
  0xf4   :  { %v1127_v43 = vpop.eup %1126  ;;  %v425_v45 = vadd.f32 %v424_v37, %v423_v42  ;;  %1142 = vtanh.f32 %v263_v38  ;;  %v278_v48 = vadd.f32 %v1015_v46, %v1409_v53  ;;  %v272_v49 = vpop.f32.mrb[11].mxu0  ;;  %v523_v50 = vsel %vm413_vm3, %v1125_v41, 0.0 }
  0xf5   :  { %v1129_v47 = vpop.eup %1128  ;;  %v522_v51 = vsel %vm413_vm3, %v1127_v43, 0.0  ;;  %1144 = vtanh.f32 %v368_v34  ;;  %v273_v56 = vadd.f32 %v1409_v53, %v272_v49  ;;  %v419_v10 = vrot.slane %v418_v60, 2 }
  0xf6   :  { %v1131_v52 = vpop.eup %1130  ;;  %v426_v54 = vrot.slane %v425_v45, 4  ;;  %v433_v55 = vsel %vm413_vm3, %v1129_v47, 0.0  ;;  %1146 = vtanh.f32 %v363_v40  ;;  %v1445_v58 = vadd.f32 %v523_v50, %v522_v51 }
  0xf7   :  { %v432_v57 = vsel %vm413_vm3, %v1131_v52, 0.0  ;;  %1148 = vtanh.f32 %v278_v48  ;;  %v1133_v59 = vpop.eup %1132  ;;  %v1018_v63 = vpop.f32.mrb[12].mxu0  ;;  %v420_v27 = vadd.f32 %v419_v10, %v418_v60 }
  0xf8   :  { %v427_v61 = vadd.f32 %v426_v54, %v425_v45  ;;  %v434_v62 = vadd.f32 %v433_v55, %v432_v57  ;;  %1150 = vtanh.f32 %v273_v56  ;;  %v1135_v0 = vpop.eup %1134  ;;  %v288_v1 = vadd.f32 %v1018_v63, %v1409_v53  ;;  %v282_v2 = vpop.f32.mrb[13].mxu0 }
  0xf9   :  { %v1137_v3 = vpop.eup %1136  ;;  %v442_v6 = vsel %vm413_vm3, %v1135_v0, 0.0  ;;  %v283_v9 = vadd.f32 %v1409_v53, %v282_v2  ;;  %v532_v31 = vsel %vm413_vm3, %v1133_v59, 0.0  ;;  %v421_v47 = vrot.slane %v420_v27, 1 }
  0xfa   :  { %v428_v4 = vrot.slane %v427_v61, 2  ;;  %v435_v5 = vrot.slane %v434_v62, 4  ;;  %v1139_v7 = vpop.eup %1138  ;;  %v441_v8 = vsel %vm413_vm3, %v1137_v3, 0.0  ;;  %1152 = vtanh.f32 %v288_v1 }
  0xfb   :  { %v443_v12 = vadd.f32 %v442_v6, %v441_v8  ;;  %v1021_v13 = vpop.f32.mrb[14].mxu0  ;;  %1154 = vtanh.f32 %v283_v9  ;;  %v531_v37 = vsel %vm413_vm3, %v1139_v7, 0.0 }
  0xfc   :  { %v436_v11 = vadd.f32 %v435_v5, %v434_v62  ;;  %v1141_v14 = vpop.eup %1140  ;;  %v298_v15 = vadd.f32 %v1021_v13, %v1409_v53  ;;  %v292_v16 = vpop.f32.mrb[15].mxu0  ;;  %v429_v18 = vadd.f32 %v428_v4, %v427_v61  ;;  %v1463_v45 = vadd.f32 %v532_v31, %v531_v37 }
  0xfd   :  { %v444_v20 = vrot.slane %v443_v12, 4  ;;  %v451_v21 = vsel %vm413_vm3, %v1141_v14, 0.0  ;;  %v293_v36 = vadd.f32 %v1409_v53, %v292_v16 }
  0xfe   :  { %v1143_v17 = vpop.eup %1142  ;;  %v437_v19 = vrot.slane %v436_v11, 2  ;;  %1156 = vtanh.f32 %v298_v15  ;;  %v430_v41 = vrot.slane %v429_v18, 1 }
  0xff   :  { %v1145_v22 = vpop.eup %1144  ;;  %v450_v23 = vsel %vm413_vm3, %v1143_v17, 0.0  ;;  %v445_v28 = vadd.f32 %v444_v20, %v443_v12  ;;  %v1024_v32 = vpop.f32.mrb[16].mxu0  ;;  %1158 = vtanh.f32 %v293_v36 }
 0x100   :  { %v1147_v26 = vpop.eup %1146  ;;  %v452_v30 = vadd.f32 %v451_v21, %v450_v23  ;;  %v438_v34 = vadd.f32 %v437_v19, %v436_v11  ;;  %v308_v38 = vadd.f32 %v1024_v32, %v1409_v53  ;;  %v302_v40 = vpop.f32.mrb[17].mxu0  ;;  %v541_v55 = vsel %vm413_vm3, %v1145_v22, 0.0 }
 0x101   :  { %v1149_v33 = vpop.eup %1148  ;;  %v446_v35 = vrot.slane %v445_v28, 2  ;;  %v303_v46 = vadd.f32 %v1409_v53, %v302_v40  ;;  %v540_v56 = vsel %vm413_vm3, %v1147_v26, 0.0  ;;  %v431_v59 = vadd.f32 %v430_v41, %v429_v18 }
 0x102   :  { %v1151_v29 = vpop.eup %1150  ;;  %v453_v42 = vrot.slane %v452_v30, 4  ;;  %v460_v43 = vsel %vm413_vm3, %v1149_v33, 0.0  ;;  %v439_v54 = vrot.slane %v438_v34, 1  ;;  %1160 = vtanh.f32 %v308_v38 }
 0x103   :  { %v459_v44 = vsel %vm413_vm3, %v1151_v29, 0.0  ;;  %v447_v48 = vadd.f32 %v446_v35, %v445_v28  ;;  %v1027_v51 = vpop.f32.mrb[18].mxu0  ;;  %1162 = vtanh.f32 %v303_v46  ;;  %v1469_v0 = vadd.f32 %v541_v55, %v540_v56 }
 0x104   :  { %v454_v49 = vadd.f32 %v453_v42, %v452_v30  ;;  %v461_v50 = vadd.f32 %v460_v43, %v459_v44  ;;  %v1153_v52 = vpop.eup %1152  ;;  %v312_v57 = vpop.f32.mrb[19].mxu0  ;;  %v318_v1 = vadd.f32 %v1027_v51, %v1409_v53  ;;  %1164 = vtanh.f32 %v378_v24 }
 0x105   :  { %v469_v61 = vsel %vm413_vm3, %v1153_v52, 0.0  ;;  %v1155_v62 = vpop.eup %1154  ;;  %v313_v2 = vadd.f32 %v1409_v53, %v312_v57  ;;  %v448_v6 = vrot.slane %v447_v48, 1  ;;  %v440_v8 = vadd.f32 %v439_v54, %v438_v34 }
 0x106   :  { %v462_v60 = vrot.slane %v461_v50, 4  ;;  %v455_v63 = vrot.slane %v454_v49, 2  ;;  %v468_v4 = vsel %vm413_vm3, %v1155_v62, 0.0  ;;  %1166 = vtanh.f32 %v318_v1 }
 0x107   :  { %v1030_v5 = vpop.f32.mrb[20].mxu0  ;;  %v470_v9 = vadd.f32 %v469_v61, %v468_v4  ;;  %v422_v11 = vadd.f32 %v421_v47, %v420_v27  ;;  %1168 = vtanh.f32 %v313_v2  ;;  %v449_v16 = vadd.f32 %v448_v6, %v447_v48 }
 0x108   :  { %v463_v3 = vadd.f32 %v462_v60, %v461_v50  ;;  %v1157_v7 = vpop.eup %1156  ;;  %v322_v10 = vpop.f32.mrb[21].mxu0  ;;  %v328_v12 = vadd.f32 %v1030_v5, %v1409_v53  ;;  %1170 = vtanh.f32 %v373_v25  ;;  %v456_v17 = vadd.f32 %v455_v63, %v454_v49 }
 0x109   :  { %v323_v13 = vadd.f32 %v1409_v53, %v322_v10  ;;  %v471_v14 = vrot.slane %v470_v9, 4  ;;  %v478_v15 = vsel %vm413_vm3, %v1157_v7, 0.0  ;;  %v673_v19 = vsel %vm672_vm4, %v431_v59, %v422_v11  ;;  %v1159_v20 = vpop.eup %1158 }
 0x10a   :  { %1172 = vtanh.f32 %v328_v12  ;;  %v464_v18 = vrot.slane %v463_v3, 2  ;;  %v675_v22 = vsel %vm674_vm5, %v440_v8, %v673_v19  ;;  %v477_v23 = vsel %vm413_vm3, %v1159_v20, 0.0 }
 0x10b   :  { %1174 = vtanh.f32 %v323_v13  ;;  %v472_v21 = vadd.f32 %v471_v14, %v470_v9  ;;  %v457_v24 = vrot.slane %v456_v17, 1  ;;  %v677_v53 = vsel %vm676_vm6, %v449_v16, %v675_v22 }
 0x10c   :  { %v465_v26 = vadd.f32 %v464_v18, %v463_v3  ;;  %v1161_v27 = vpop.eup %1160  ;;  %v516_v25 = vrot.slane %v1435_v39, 4  ;;  %v479_v28 = vadd.f32 %v478_v15, %v477_v23  ;;  %v525_v29 = vrot.slane %v1445_v58, 4 }
 0x10d   :  { %v473_v30 = vrot.slane %v472_v21, 2  ;;  %v1163_v31 = vpop.eup %1162  ;;  %v487_v32 = vsel %vm413_vm3, %v1161_v27, 0.0  ;;  %v458_v33 = vadd.f32 %v457_v24, %v456_v17  ;;  %v534_v46 = vrot.slane %v1463_v45, 4 }
 0x10e   :  { %v466_v34 = vrot.slane %v465_v26, 1  ;;  %v486_v36 = vsel %vm413_vm3, %v1163_v31, 0.0  ;;  %v480_v38 = vrot.slane %v479_v28, 4  ;;  %v1165_v40 = vpop.eup %1164  ;;  %v517_v44 = vadd.f32 %v516_v25, %v1435_v39 }
 0x10f   :  { %v474_v37 = vadd.f32 %v473_v30, %v472_v21  ;;  %v488_v41 = vadd.f32 %v487_v32, %v486_v36  ;;  %v679_v42 = vsel %vm678_vm7, %v458_v33, %v677_v53  ;;  %v550_v52 = vsel %vm413_vm3, %v1165_v40, 0.0 }
 0x110   :  { %v467_v35 = vadd.f32 %v466_v34, %v465_v26  ;;  %v1167_v43 = vpop.eup %1166  ;;  %v481_v48 = vadd.f32 %v480_v38, %v479_v28  ;;  %v543_v56 = vrot.slane %v1469_v0, 4  ;;  %v526_v61 = vadd.f32 %v525_v29, %v1445_v58 }
 0x111   :  { %v475_v47 = vrot.slane %v474_v37, 1  ;;  %v1169_v49 = vpop.eup %1168  ;;  %v489_v50 = vrot.slane %v488_v41, 4  ;;  %v496_v51 = vsel %vm413_vm3, %v1167_v43, 0.0  ;;  %v535_v7 = vadd.f32 %v534_v46, %v1463_v45 }
 0x112   :  { %v681_v54 = vsel %vm680_vm8, %v467_v35, %v679_v42  ;;  %v1171_v55 = vpop.eup %1170  ;;  %v495_v57 = vsel %vm413_vm3, %v1169_v49, 0.0  ;;  %v482_v60 = vrot.slane %v481_v48, 2  ;;  %v544_v11 = vadd.f32 %v543_v56, %v1469_v0 }
 0x113   :  { %v476_v59 = vadd.f32 %v475_v47, %v474_v37  ;;  %v490_v62 = vadd.f32 %v489_v50, %v488_v41  ;;  %v497_v63 = vadd.f32 %v496_v51, %v495_v57  ;;  %v549_v1 = vsel %vm413_vm3, %v1171_v55, 0.0 }
 0x114   :  { %v1173_v39 = vpop.eup %1172  ;;  %v551_v3 = vadd.f32 %v550_v52, %v549_v1  ;;  %v483_v5 = vadd.f32 %v482_v60, %v481_v48  ;;  %v518_v14 = vrot.slane %v517_v44, 2  ;;  %v527_v17 = vrot.slane %v526_v61, 2  ;;  %v936_v60 = vld [vmem:[%s1536_s3 + $0x42] ss:$0 sm:$0xff] }
 0x115   :  { %v1175_v2 = vpop.eup %1174  ;;  %v505_v4 = vsel %vm413_vm3, %v1173_v39, 0.0  ;;  %v683_v6 = vsel %vm682_vm9, %v476_v59, %v681_v54  ;;  %v491_v8 = vrot.slane %v490_v62, 2  ;;  %v498_v9 = vrot.slane %v497_v63, 4 }
 0x116   :  { %v504_v10 = vsel %vm413_vm3, %v1175_v2, 0.0  ;;  %v552_v58 = vrot.slane %v551_v3, 4  ;;  %v484_v13 = vrot.slane %v483_v5, 1  ;;  %v536_v21 = vrot.slane %v535_v7, 2  ;;  %v799_v2 = vld [vmem:[%s1536_s3 + $0x48] sm:$0xff] }
 0x117   :  { %v506_v12 = vadd.f32 %v505_v4, %v504_v10  ;;  %v492_v15 = vadd.f32 %v491_v8, %v490_v62  ;;  %v499_v16 = vadd.f32 %v498_v9, %v497_v63  ;;  %v545_v24 = vrot.slane %v544_v11, 2 }
 0x118   :  { %v485_v19 = vadd.f32 %v484_v13, %v483_v5  ;;  %v553_v20 = vadd.f32 %v552_v58, %v551_v3  ;;  %v519_v26 = vadd.f32 %v518_v14, %v517_v44  ;;  %v528_v25 = vadd.f32 %v527_v17, %v526_v61 }
 0x119   :  { %v507_v18 = vrot.slane %v506_v12, 4  ;;  %v500_v22 = vrot.slane %v499_v16, 2  ;;  %v493_v53 = vrot.slane %v492_v15, 1  ;;  %v537_v31 = vadd.f32 %v536_v21, %v535_v7 }
 0x11a   :  { %v685_v23 = vsel %vm684_vm10, %v485_v19, %v683_v6  ;;  %v554_v27 = vrot.slane %v553_v20, 2  ;;  %v546_v33 = vadd.f32 %v545_v24, %v544_v11  ;;  %v520_v34 = vrot.slane %v519_v26, 1 }
 0x11b   :  { %v508_v45 = vadd.f32 %v507_v18, %v506_v12  ;;  %v501_v0 = vadd.f32 %v500_v22, %v499_v16  ;;  %1067 = vmatprep.mubr.msk.f32.mxu1 %vm413_vm3, %v685_v23  ;;  %v494_v36 = vadd.f32 %v493_v53, %v492_v15  ;;  %v529_v29 = vrot.slane %v528_v25, 1  ;;  %v937_v12 = vld [vmem:[%s1536_s3 + $0x43] ss:$0 sm:$0xff] }
 0x11c   :  { %v555_v38 = vadd.f32 %v554_v27, %v553_v20  ;;  %v538_v41 = vrot.slane %v537_v31, 1  ;;  %v547_v43 = vrot.slane %v546_v33, 1  ;;  %v521_v44 = vadd.f32 %v520_v34, %v519_v26 }
 0x11d   :  { %v509_v28 = vrot.slane %v508_v45, 2  ;;  %v502_v30 = vrot.slane %v501_v0, 1  ;;  %v530_v47 = vadd.f32 %v529_v29, %v528_v25  ;;  %v1200_v59 = vmov 0  }
 0x11e   :  { %v556_v46 = vrot.slane %v555_v38, 1  ;;  %v539_v49 = vadd.f32 %v538_v41, %v537_v31  ;;  %v548_v51 = vadd.f32 %v547_v43, %v546_v33  ;;  %1111 = vset.pattern.permute.xlu0 %v1200_v59  ;;  %v1201_v1 = vmov 0.0  }
 0x11f   :  { %v510_v32 = vadd.f32 %v509_v28, %v508_v45  ;;  %v503_v37 = vadd.f32 %v502_v30, %v501_v0  ;;  %1070 = vmatprep.subr.mxu1 %v1201_v1  ;;  %v786_v3 = vlaneseq }
 0x120   :  { %v557_v54 = vadd.f32 %v556_v46, %v555_v38 }
 0x121   :  { %v511_v40 = vrot.slane %v510_v32, 1  ;;  %v686_v35 = vsel %vm672_vm4, %v503_v37, %v494_v36  ;;  %v787_v4 = vand.u32 127, %v786_v3  ;;  %v789_v5 = vshrl.u32 %v786_v3, 7 }
 0x123   :  { %v512_v42 = vadd.f32 %v511_v40, %v510_v32  ;;  %v790_v7 = vsub.s32 %v787_v4, %v789_v5 }
 0x125   :  { %v687_v48 = vsel %vm674_vm5, %v512_v42, %v686_v35 }
 0x126   :  { %v688_v50 = vsel %vm676_vm6, %v521_v44, %v687_v48 }
 0x127   :  { %v689_v52 = vsel %vm678_vm7, %v530_v47, %v688_v50 }
 0x128   :  { %v690_v55 = vsel %vm680_vm8, %v539_v49, %v689_v52 }
 0x129   :  { %v691_v56 = vsel %vm682_vm9, %v548_v51, %v690_v55 }
 0x12a   :  { %v692_v57 = vsel %vm684_vm10, %v557_v54, %v691_v56 }
 0x12b   :  { %1068 = vmatmul.mubr.msk.f32.vlgmr.msra.gmra.mrb[10].mxu1 %vm413_vm3, %v692_v57 }
 0x12c   :  { %1071 = vmatpush3.msra.mxu1 %v799_v2  ;;  %1072 = vmatprep.mubr.msk.f32.mxu1 %vm1202_vm11, %v1201_v1 }
 0x1fe   :  { %v1069_v39 = vpop.f32.mrb[10].mxu1 }
 0x1ff   :  { %v777_v61 = vadd.f32 %v1069_v39, %v936_v60  ;;  %v763_v62 = vpop.f32.mrb[11].mxu1 }
 0x200   :  { %v776_v63 = vadd.f32 %v936_v60, %v763_v62 }
 0x201   :  { %880 = vst [vmem:[#allocation2 + $0x8] sm:$0xff] %v777_v61 }
 0x202   :  { %879 = vst [vmem:[#allocation2] sm:$0xff] %v776_v63  ;;  %781 = vperm.xlu0 %1111, %v776_v63  }
 0x206   :  { %784 = vperm.xlu0 %1111, %v777_v61  }
 0x281   :  { %v782_v6 = vpop.permute.xlu0 %781 }
 0x282   :  { %v791_v9 = vrot.slane %v782_v6, %v790_v7 }
 0x285   :  { %v785_v8 = vpop.permute.xlu0 %784 }
 0x286   :  { %v795_v10 = vrot.slane %v785_v8, %v790_v7 }
 0x288   :  { %v796_v11 = vsel %vm672_vm4, %v795_v10, %v791_v9 }
 0x289   :  { %v798_v58 = vsel %vm577_vm1, %v796_v11, 0.0 }
 0x28a   :  { %1073 = vmatmul.mubr.msk.f32.vlgmr.msra.gmra.mrb[12].mxu1 %vm805_vm12, %v798_v58 }
 0x35d   :  { %v875_v13 = vpop.f32.mrb[12].mxu1 }
 0x35e   :  { %v876_v14 = vadd.f32 %v937_v12, %v875_v13  ;;  %v1074_v15 = vpop.f32.mrb[13].mxu1 }
 0x360   :  { %881 = vst [vmem:[#allocation2 + $0x10] sm:$0xff] %v876_v14 }
 0x361   :  { %1187 = shalt.err (!%p1184_p4)
}
 0x362   :  { %s1188_s0 = scalar_lea.hbm %s1537_s4, 384 }
 0x363   :  { %p1189_p5 = scmp.ne.s32.totalorder %s1537_s4, %s1188_s0  ;;  %p1192_p6 = scmp.lt.u32.totalorder %s1188_s0, %s1537_s4 }
 0x365   :  { %p1194_p7 = pnand %p1192_p6, %p1189_p5 }
 0x367   :  { %1197 = shalt.err (!%p1194_p7)
}
 0x368   :  { %s1204_s18 = smov 128   ;;  %s1205_s19 = smov 8  }
 0x369   :  { %893 = dma.vmem_to_hbm [thread:$0]  %s888_s11, 384, %s1537_s4, [#allocation3], %s1204_s18, %s1204_s18, %s1205_s19  }
 0x36a   :  { %1198 = dma.done.wait [#allocation3], 384  }
 0x36b   :  { %1199 = vsyncadd [#allocation3], 4294966912 }
 0x36c   :  { %897 = vsyncpa [#allocation3], 1 }

</bundles_post_ra>
